<compile_context>
chip_gen: v6e
topology: v6e:2x2x1
jax: 0.10.0
libtpu: 0.0.40
codegen_flags: <defaults>
</compile_context>

<pallas_src>
import functools

import jax
import jax.numpy as jnp
from jax.experimental import pallas as pl
from jax.experimental.pallas import tpu as pltpu


def _advers_kernel(x_ref, w1_ref, b1_ref, w2_ref, b2_ref, w3_ref, b3_ref, o_ref):
    # Layer 1: Linear(in_feature -> H) + ReLU  (dropout1 = identity in eval).
    # bf16 operands on the MXU, f32 accumulate; bias/ReLU in f32.
    h1 = jnp.dot(x_ref[...], w1_ref[...], preferred_element_type=jnp.float32)
    h1 = jnp.maximum(h1 + b1_ref[...], 0.0)

    # Layer 2: Linear(H -> H) + ReLU           (dropout2 = identity in eval).
    h2 = jnp.dot(h1.astype(jnp.bfloat16), w2_ref[...],
                 preferred_element_type=jnp.float32)
    h2 = jnp.maximum(h2 + b2_ref[...], 0.0)

    # Layer 3: Linear(H -> 1). out_features == 1, so skip the MXU: VPU multiply
    # + lane reduction, then store the batch tile lane-dense as a (1, TM) row.
    y = jnp.sum(h2 * w3_ref[...], axis=-1)                # (TM,)
    y = y + b3_ref[0]                                      # scalar bias (SMEM)
    o_ref[...] = y.reshape(1, -1).astype(o_ref.dtype)      # (1, TM) lane-dense


@functools.partial(jax.jit, static_argnames=("tm",))
def advers_net_forward(x, params, *, tm=128):
    """Fused forward pass of Advers_net. x: (B, in_feature) float32 -> (B, 1)."""
    w1, b1, w2, b2, w3, b3 = params
    B, F = x.shape
    H = w1.shape[1]

    # Pad batch to a multiple of the batch tile (TM=128; use 256 on v6e/v7x for
    # very large batches). Padded rows are sliced off after the call.
    b_pad = ((B + tm - 1) // tm) * tm
    grid = (b_pad // tm,)

    # bf16 MXU operands (halves x / weight DMA); biases stay f32.
    x_p = jnp.pad(x.astype(jnp.bfloat16), ((0, b_pad - B), (0, 0)))
    w1b = w1.astype(jnp.bfloat16)
    w2b = w2.astype(jnp.bfloat16)
    w3_row = w3.reshape(1, H).astype(jnp.float32)   # used on the VPU -> keep f32
    b3_s = b3.reshape(1).astype(jnp.float32)        # scalar, lives in SMEM

    out = pl.pallas_call(
        _advers_kernel,
        out_shape=jax.ShapeDtypeStruct((1, b_pad), jnp.float32),
        grid=grid,
        in_specs=[
            pl.BlockSpec((tm, F), lambda i: (i, 0)),   # x batch tile (pipelined)
            pl.BlockSpec((F, H), lambda i: (0, 0)),    # w1 (VMEM-resident)
            pl.BlockSpec((1, H), lambda i: (0, 0)),    # b1
            pl.BlockSpec((H, H), lambda i: (0, 0)),    # w2
            pl.BlockSpec((1, H), lambda i: (0, 0)),    # b2
            pl.BlockSpec((1, H), lambda i: (0, 0)),    # w3 row
            pl.BlockSpec(memory_space=pltpu.MemorySpace.SMEM),  # b3 scalar
        ],
        out_specs=pl.BlockSpec((1, tm), lambda i: (0, i)),      # lane-dense row
        compiler_params=pltpu.CompilerParams(
            dimension_semantics=("parallel",)),        # v7x: split batch on 2 TCs
    )(x_p, w1b, b1, w2b, b2, w3_row, b3_s)

    # Undo the lane-dense slab layout: row order is preserved.
    return out[0, :B].reshape(B, 1)


def init_params(key, in_feature, hidden_size):
    """Deterministic init mirroring init_weights: kaiming_normal W, zero bias.

    PyTorch Linear weight is (out, in); we store (in, out) so the kernel does
    x @ W. kaiming_normal_ (fan_in mode): std = sqrt(2 / fan_in).
    """
    k1, k2, k3 = jax.random.split(key, 3)
    w1 = jax.random.normal(k1, (in_feature, hidden_size), jnp.float32) * jnp.sqrt(
        2.0 / in_feature)
    w2 = jax.random.normal(k2, (hidden_size, hidden_size), jnp.float32) * jnp.sqrt(
        2.0 / hidden_size)
    w3 = jax.random.normal(k3, (hidden_size, 1), jnp.float32) * jnp.sqrt(
        2.0 / hidden_size)
    b1 = jnp.zeros((1, hidden_size), jnp.float32)
    b2 = jnp.zeros((1, hidden_size), jnp.float32)
    b3 = jnp.zeros((1, 1), jnp.float32)
    return (w1, b1, w2, b2, w3, b3)


def reference_forward(x, params):
    """Plain-JAX reference with the same bf16-operand / f32-accumulate recipe."""
    w1, b1, w2, b2, w3, b3 = params
    h = jnp.dot(x.astype(jnp.bfloat16), w1.astype(jnp.bfloat16),
                preferred_element_type=jnp.float32)
    h = jnp.maximum(h + b1, 0.0)
    h = jnp.dot(h.astype(jnp.bfloat16), w2.astype(jnp.bfloat16),
                preferred_element_type=jnp.float32)
    h = jnp.maximum(h + b2, 0.0)
    y = jnp.sum(h * w3.reshape(1, -1), axis=-1, keepdims=True) + b3
    return y


if __name__ == "__main__":
    # TODO(synk): grl_hook / calc_coeff gradient reversal is backward-only; the
    # forward output is unaffected, so only the forward is implemented here.
    batch, in_feature, hidden_size = 8, 16, 32

    key = jax.random.PRNGKey(0)
    kx, kp = jax.random.split(key)
    x = jax.random.normal(kx, (batch, in_feature), jnp.float32)
    params = init_params(kp, in_feature, hidden_size)

    y = advers_net_forward(x, params)
    y = jax.block_until_ready(y)

    y_ref = reference_forward(x, params)
    assert y.shape == (batch, 1)
    assert jnp.allclose(y, y_ref, atol=1e-4, rtol=1e-3), "mismatch vs reference"

    print("KERNEL_OK")
</pallas_src>

<mosaic_0001>
module attributes {stable_mosaic.version = 11 : i64} {
  func.func @_advers_kernel(%arg0: i32, %arg1: memref<128x16xbf16, #tpu.memory_space<vmem>>, %arg2: memref<16x32xbf16, #tpu.memory_space<vmem>>, %arg3: memref<1x32xf32, #tpu.memory_space<vmem>>, %arg4: memref<32x32xbf16, #tpu.memory_space<vmem>>, %arg5: memref<1x32xf32, #tpu.memory_space<vmem>>, %arg6: memref<1x32xf32, #tpu.memory_space<vmem>>, %arg7: memref<1xf32, #tpu.memory_space<smem>>, %arg8: memref<1x128xf32, #tpu.memory_space<vmem>>) attributes {dimension_semantics = [#tpu.dimension_semantics<parallel>], iteration_bounds = array<i64: 1>, scalar_prefetch = 0 : i64, scratch_operands = 0 : i64, tpu.core_type = #tpu.core_type<tc>, window_params = [{transform_indices = @transform_0, window_bounds = array<i64: 128, 16>}, {pipeline_mode = #tpu.pipeline_mode<synchronous>, transform_indices = @transform_1, window_bounds = array<i64: 16, 32>}, {pipeline_mode = #tpu.pipeline_mode<synchronous>, transform_indices = @transform_2, window_bounds = array<i64: 1, 32>}, {pipeline_mode = #tpu.pipeline_mode<synchronous>, transform_indices = @transform_3, window_bounds = array<i64: 32, 32>}, {pipeline_mode = #tpu.pipeline_mode<synchronous>, transform_indices = @transform_4, window_bounds = array<i64: 1, 32>}, {pipeline_mode = #tpu.pipeline_mode<synchronous>, transform_indices = @transform_5, window_bounds = array<i64: 1, 32>}, {transform_indices = @transform_6, window_bounds = array<i64: 1>}, {transform_indices = @transform_7, window_bounds = array<i64: 1, 128>}]} {
    %c0 = arith.constant 0 : index
    %c0_0 = arith.constant 0 : index
    %0 = vector.load %arg1[%c0, %c0_0] : memref<128x16xbf16, #tpu.memory_space<vmem>>, vector<128x16xbf16>
    %c0_1 = arith.constant 0 : index
    %c0_2 = arith.constant 0 : index
    %1 = vector.load %arg2[%c0_1, %c0_2] : memref<16x32xbf16, #tpu.memory_space<vmem>>, vector<16x32xbf16>
    %cst = arith.constant dense<0.000000e+00> : vector<128x32xf32>
    %2 = tpu.matmul %0, %1, %cst {dimension_numbers = #tpu.dot_dimension_numbers<[1], [0], [0], [1], [0, 0, 1, 1], [], []>} : vector<128x16xbf16>, vector<16x32xbf16>, vector<128x32xf32> -> vector<128x32xf32>
    %c0_3 = arith.constant 0 : index
    %c0_4 = arith.constant 0 : index
    %3 = vector.load %arg3[%c0_3, %c0_4] : memref<1x32xf32, #tpu.memory_space<vmem>>, vector<1x32xf32>
    %4 = vector.broadcast %3 : vector<1x32xf32> to vector<128x32xf32>
    %5 = arith.addf %2, %4 : vector<128x32xf32>
    %cst_5 = arith.constant 0.000000e+00 : f32
    %6 = vector.broadcast %cst_5 : f32 to vector<128x32xf32>
    %7 = arith.maximumf %5, %6 : vector<128x32xf32>
    %8 = arith.truncf %7 : vector<128x32xf32> to vector<128x32xbf16>
    %c0_6 = arith.constant 0 : index
    %c0_7 = arith.constant 0 : index
    %9 = vector.load %arg4[%c0_6, %c0_7] : memref<32x32xbf16, #tpu.memory_space<vmem>>, vector<32x32xbf16>
    %cst_8 = arith.constant dense<0.000000e+00> : vector<128x32xf32>
    %10 = tpu.matmul %8, %9, %cst_8 {dimension_numbers = #tpu.dot_dimension_numbers<[1], [0], [0], [1], [0, 0, 1, 1], [], []>} : vector<128x32xbf16>, vector<32x32xbf16>, vector<128x32xf32> -> vector<128x32xf32>
    %c0_9 = arith.constant 0 : index
    %c0_10 = arith.constant 0 : index
    %11 = vector.load %arg5[%c0_9, %c0_10] : memref<1x32xf32, #tpu.memory_space<vmem>>, vector<1x32xf32>
    %12 = vector.broadcast %11 : vector<1x32xf32> to vector<128x32xf32>
    %13 = arith.addf %10, %12 : vector<128x32xf32>
    %cst_11 = arith.constant 0.000000e+00 : f32
    %14 = vector.broadcast %cst_11 : f32 to vector<128x32xf32>
    %15 = arith.maximumf %13, %14 : vector<128x32xf32>
    %c0_12 = arith.constant 0 : index
    %c0_13 = arith.constant 0 : index
    %16 = vector.load %arg6[%c0_12, %c0_13] : memref<1x32xf32, #tpu.memory_space<vmem>>, vector<1x32xf32>
    %17 = vector.broadcast %16 : vector<1x32xf32> to vector<128x32xf32>
    %18 = arith.mulf %15, %17 : vector<128x32xf32>
    %cst_14 = arith.constant dense<0.000000e+00> : vector<128xf32>
    %19 = vector.multi_reduction <add>, %18, %cst_14 [1] : vector<128x32xf32> to vector<128xf32>
    %c0_15 = arith.constant 0 : index
    %20 = memref.load %arg7[%c0_15] : memref<1xf32, #tpu.memory_space<smem>>
    %21 = vector.broadcast %20 : f32 to vector<128xf32>
    %22 = arith.addf %19, %21 : vector<128xf32>
    %23 = vector.shape_cast %22 : vector<128xf32> to vector<1x128xf32>
    %c0_16 = arith.constant 0 : index
    %c0_17 = arith.constant 0 : index
    %24 = vector.load %arg8[%c0_16, %c0_17] : memref<1x128xf32, #tpu.memory_space<vmem>>, vector<1x128xf32>
    tpu.vector_store %arg8[%c0_16, %c0_17], %23 {strides = array<i32>} : memref<1x128xf32, #tpu.memory_space<vmem>>, vector<1x128xf32>,
    return
  }
  func.func @transform_0(%arg0: i32) -> (i32, i32) {
    %c0_i32 = arith.constant 0 : i32
    %c0_i32_0 = arith.constant 0 : i32
    return %arg0, %c0_i32 : i32, i32
  }
  func.func @transform_1(%arg0: i32) -> (i32, i32) {
    %c0_i32 = arith.constant 0 : i32
    %c0_i32_0 = arith.constant 0 : i32
    %c0_i32_1 = arith.constant 0 : i32
    return %c0_i32, %c0_i32_0 : i32, i32
  }
  func.func @transform_2(%arg0: i32) -> (i32, i32) {
    %c0_i32 = arith.constant 0 : i32
    %c0_i32_0 = arith.constant 0 : i32
    %c0_i32_1 = arith.constant 0 : i32
    return %c0_i32, %c0_i32_0 : i32, i32
  }
  func.func @transform_3(%arg0: i32) -> (i32, i32) {
    %c0_i32 = arith.constant 0 : i32
    %c0_i32_0 = arith.constant 0 : i32
    %c0_i32_1 = arith.constant 0 : i32
    return %c0_i32, %c0_i32_0 : i32, i32
  }
  func.func @transform_4(%arg0: i32) -> (i32, i32) {
    %c0_i32 = arith.constant 0 : i32
    %c0_i32_0 = arith.constant 0 : i32
    %c0_i32_1 = arith.constant 0 : i32
    return %c0_i32, %c0_i32_0 : i32, i32
  }
  func.func @transform_5(%arg0: i32) -> (i32, i32) {
    %c0_i32 = arith.constant 0 : i32
    %c0_i32_0 = arith.constant 0 : i32
    %c0_i32_1 = arith.constant 0 : i32
    return %c0_i32, %c0_i32_0 : i32, i32
  }
  func.func @transform_6(%arg0: i32) -> i32 {
    %c0_i32 = arith.constant 0 : i32
    %c0_i32_0 = arith.constant 0 : i32
    return %c0_i32 : i32
  }
  func.func @transform_7(%arg0: i32) -> (i32, i32) {
    %c0_i32 = arith.constant 0 : i32
    %c0_i32_0 = arith.constant 0 : i32
    return %c0_i32, %arg0 : i32, i32
  }
}

</mosaic_0001>

<bundles_post_ra>
// kernel: advers_net_forward.1
= control target key start
LH: loop header
LB: loop body
LE: loop exit
PB: predicated region body
PF: predicated region fallthrough
CT: control target
= control target key end

     0   :  { %vm99_vm0 = vcmask 130048   ;;  %vm268_vm1 = vcmask 261120   ;;  %vm522_vm2 = vcmask 130112   ;;  %vm529_vm3 = vcmask 195712   ;;  %s936_s1 = inlined_call_operand.vmem [shape: bf16[16,32], index: 1, kind: input, shape index: {}]   ;;  %s937_s0 = inlined_call_operand.vmem [shape: bf16[128,16], index: 0, kind: input, shape index: {}]   ;;  %s938_s3 = inlined_call_operand.vmem [shape: bf16[32,32], index: 3, kind: input, shape index: {}]   ;;  %s939_s2 = inlined_call_operand.vmem [shape: f32[1,32], index: 2, kind: input, shape index: {}]   ;;  %s940_s4 = inlined_call_operand.vmem [shape: f32[1,32], index: 4, kind: input, shape index: {}]   ;;  %s941_s5 = inlined_call_operand.vmem [shape: f32[1,32], index: 5, kind: input, shape index: {}]   ;;  %s942_s6 = inlined_call_operand.<no memory space> [shape: f32[1], index: 6, kind: input, shape index: {}]   ;;  %s943_s7 = inlined_call_operand.vmem [shape: f32[1,128], index: 7, kind: output, shape index: {}]  }
   0x1   :  { %v715_v0 = vld [vmem:[%s936_s1] sm:$0xff]   ;;  %v717_v2 = vld [vmem:[%s937_s0 + $0x8] sm:$0xff]   ;;  %v718_v3 = vld [vmem:[%s937_s0 + $0x10] sm:$0xff]   ;;  %vm536_vm4 = vcmask 261312   ;;  %vm543_vm5 = vcmask 326912   ;;  %vm550_vm6 = vcmask 392512  }
   0x2   :  { %v716_v1 = vld [vmem:[%s937_s0] sm:$0xff]   ;;  %677 = vmatprep.subr.bf16.mxu0 %v715_v0  ;;  %v719_v4 = vld [vmem:[%s937_s0 + $0x18] sm:$0xff]   ;;  %v721_v6 = vld [vmem:[%s937_s0 + $0x28] sm:$0xff]   ;;  %vm557_vm7 = vcmask 458112   ;;  %vm564_vm8 = vcmask 523712   ;;  %vm571_vm9 = vcmask 589312  }
   0x3   :  { %678 = vmatpush3.bf16.msra.mxu0 %v715_v0  ;;  %679 = vmatprep.mubr.msk.bf16.mxu0 %vm99_vm0, %v716_v1  ;;  %v720_v5 = vld [vmem:[%s937_s0 + $0x20] sm:$0xff]   ;;  %v722_v7 = vld [vmem:[%s937_s0 + $0x30] sm:$0xff]   ;;  %v723_v8 = vld [vmem:[%s937_s0 + $0x38] sm:$0xff]   ;;  %vm578_vm10 = vcmask 654912   ;;  %vm585_vm11 = vcmask 720512   ;;  %vm592_vm12 = vcmask 786112  }
   0x4   :  { %v724_v9 = vld [vmem:[%s938_s3 + $0x8] sm:$0xff]   ;;  %v725_v10 = vld [vmem:[%s938_s3] sm:$0xff]   ;;  %vm599_vm13 = vcmask 851712   ;;  %vm606_vm14 = vcmask 917312   ;;  %vm613_vm15 = vcmask 982912  }
   0x5   :  { %695 = vmatprep.subr.bf16.mxu1 %v724_v9  ;;  %v628_v13 = vld [vmem:[%s939_s2] ss:$0 sm:$0xff] }
   0x6   :  { %680 = vmatmul.mubr.msk.bf16.vlgmr.msra.gmra.mxu0 %vm99_vm0, %v717_v2  ;;  %696 = vmatpush3.bf16.msra.mxu1 %v724_v9 }
   0x7   :  { %683 = vmatprep.mubr.msk.bf16.mxu0 %vm99_vm0, %v718_v3  ;;  %697 = vmatprep.subr.bf16.mxu1 %v725_v10 }
   0xa   :  { %698 = vmatpush3.bf16.msra.mxu1 %v725_v10 }
   0xe   :  { %684 = vmatmul.mubr.msk.bf16.gmra.mxu0 %vm99_vm0, %v719_v4  ;;  %v821_v4 = vld [vmem:[%s940_s4] ss:$0 sm:$0xff] }
   0xf   :  { %687 = vmatprep.mubr.msk.bf16.mxu0 %vm99_vm0, %v720_v5 }
  0x16   :  { %688 = vmatmul.mubr.msk.bf16.gmra.mxu0 %vm99_vm0, %v721_v6 }
  0x17   :  { %691 = vmatprep.mubr.msk.bf16.mxu0 %vm99_vm0, %v722_v7 }
  0x1e   :  { %692 = vmatmul.mubr.msk.bf16.gmra.mxu0 %vm99_vm0, %v723_v8  ;;  %v827_v8 = vld [vmem:[%s941_s5] ss:$0 sm:$0xff]  ;;  %vm620_vm0 = vcmask 1048512  }
  0xc6   :  { %v681_v11 = vpop.f32.mrf.mxu0 }
  0xc7   :  { %v167_v17 = vadd.f32 %v681_v11, %v628_v13 }
  0xc8   :  { %v158_v12 = vpop.f32.mrf.mxu0 }
  0xc9   :  { %v159_v15 = vadd.f32 %v628_v13, %v158_v12  ;;  %v223_v24 = vmax.f32 %v167_v17, 0.0 }
  0xca   :  { %v682_v14 = vpop.f32.mrf.mxu0 }
  0xcb   :  { %v170_v16 = vadd.f32 %v682_v14, %v628_v13  ;;  %v221_v22 = vmax.f32 %v159_v15, 0.0 }
  0xcc   :  { %v161_v18 = vpop.f32.mrf.mxu0 }
  0xcd   :  { %v162_v19 = vadd.f32 %v628_v13, %v161_v18  ;;  %v224_v20 = vmax.f32 %v170_v16, 0.0 }
  0xce   :  { %v685_v21 = vpop.f32.mrf.mxu0 }
  0xcf   :  { %v222_v23 = vmax.f32 %v162_v19, 0.0  ;;  %v238_v27 = vpack.c.bf16 %v224_v20, %v223_v24  ;;  %v183_v31 = vadd.f32 %v685_v21, %v628_v13 }
  0xd0   :  { %v174_v25 = vpop.f32.mrf.mxu0 }
  0xd1   :  { %v237_v26 = vpack.c.bf16 %v222_v23, %v221_v22  ;;  %v175_v29 = vadd.f32 %v628_v13, %v174_v25  ;;  %v227_v38 = vmax.f32 %v183_v31, 0.0 }
  0xd2   :  { %v686_v28 = vpop.f32.mrf.mxu0 }
  0xd3   :  { %v186_v30 = vadd.f32 %v686_v28, %v628_v13  ;;  %699 = vmatprep.mubr.msk.bf16.mxu1 %vm268_vm1, %v237_v26  ;;  %v225_v36 = vmax.f32 %v175_v29, 0.0 }
  0xd4   :  { %v177_v32 = vpop.f32.mrf.mxu0  ;;  %700 = vmatmul.mubr.msk.bf16.vlgmr.msra.gmra.mxu1 %vm268_vm1, %v238_v27 }
  0xd5   :  { %v178_v33 = vadd.f32 %v628_v13, %v177_v32  ;;  %v228_v34 = vmax.f32 %v186_v30, 0.0 }
  0xd6   :  { %v689_v35 = vpop.f32.mrf.mxu0 }
  0xd7   :  { %v226_v37 = vmax.f32 %v178_v33, 0.0  ;;  %v240_v41 = vpack.c.bf16 %v228_v34, %v227_v38  ;;  %v199_v45 = vadd.f32 %v689_v35, %v628_v13 }
  0xd8   :  { %v190_v39 = vpop.f32.mrf.mxu0 }
  0xd9   :  { %v239_v40 = vpack.c.bf16 %v226_v37, %v225_v36  ;;  %v191_v43 = vadd.f32 %v628_v13, %v190_v39  ;;  %v231_v52 = vmax.f32 %v199_v45, 0.0 }
  0xda   :  { %v690_v42 = vpop.f32.mrf.mxu0 }
  0xdb   :  { %v202_v44 = vadd.f32 %v690_v42, %v628_v13  ;;  %703 = vmatprep.mubr.msk.bf16.mxu1 %vm268_vm1, %v239_v40  ;;  %v229_v50 = vmax.f32 %v191_v43, 0.0 }
  0xdc   :  { %v193_v46 = vpop.f32.mrf.mxu0  ;;  %704 = vmatmul.mubr.msk.bf16.gmra.mxu1 %vm268_vm1, %v240_v41 }
  0xdd   :  { %v194_v47 = vadd.f32 %v628_v13, %v193_v46  ;;  %v232_v48 = vmax.f32 %v202_v44, 0.0 }
  0xde   :  { %v693_v49 = vpop.f32.mrf.mxu0 }
  0xdf   :  { %v230_v51 = vmax.f32 %v194_v47, 0.0  ;;  %v242_v55 = vpack.c.bf16 %v232_v48, %v231_v52  ;;  %v215_v59 = vadd.f32 %v693_v49, %v628_v13 }
  0xe0   :  { %v206_v53 = vpop.f32.mrf.mxu0 }
  0xe1   :  { %v241_v54 = vpack.c.bf16 %v230_v51, %v229_v50  ;;  %v207_v57 = vadd.f32 %v628_v13, %v206_v53  ;;  %v235_v1 = vmax.f32 %v215_v59, 0.0 }
  0xe2   :  { %v694_v56 = vpop.f32.mrf.mxu0 }
  0xe3   :  { %v218_v58 = vadd.f32 %v694_v56, %v628_v13  ;;  %707 = vmatprep.mubr.msk.bf16.mxu1 %vm268_vm1, %v241_v54  ;;  %v233_v63 = vmax.f32 %v207_v57, 0.0 }
  0xe4   :  { %v209_v60 = vpop.f32.mrf.mxu0  ;;  %708 = vmatmul.mubr.msk.bf16.gmra.mxu1 %vm268_vm1, %v242_v55 }
  0xe5   :  { %v210_v61 = vadd.f32 %v628_v13, %v209_v60  ;;  %v236_v62 = vmax.f32 %v218_v58, 0.0 }
  0xe7   :  { %v234_v0 = vmax.f32 %v210_v61, 0.0  ;;  %v244_v3 = vpack.c.bf16 %v236_v62, %v235_v1 }
  0xe9   :  { %v243_v2 = vpack.c.bf16 %v234_v0, %v233_v63 }
  0xeb   :  { %711 = vmatprep.mubr.msk.bf16.mxu1 %vm268_vm1, %v243_v2 }
  0xec   :  { %712 = vmatmul.mubr.msk.bf16.gmra.mxu1 %vm268_vm1, %v244_v3 }
 0x194   :  { %v701_v5 = vpop.f32.mrf.mxu1 }
 0x195   :  { %v336_v6 = vadd.f32 %v701_v5, %v821_v4 }
 0x196   :  { %v327_v7 = vpop.f32.mrf.mxu1 }
 0x197   :  { %v392_v9 = vmax.f32 %v336_v6, 0.0  ;;  %v328_v10 = vadd.f32 %v821_v4, %v327_v7 }
 0x198   :  { %v702_v11 = vpop.f32.mrf.mxu1 }
 0x199   :  { %v390_v12 = vmax.f32 %v328_v10, 0.0  ;;  %v339_v13 = vadd.f32 %v702_v11, %v821_v4  ;;  %v415_v14 = vmul.f32 %v827_v8, %v392_v9 }
 0x19a   :  { %v330_v15 = vpop.f32.mrf.mxu1 }
 0x19b   :  { %v393_v16 = vmax.f32 %v339_v13, 0.0  ;;  %v331_v17 = vadd.f32 %v821_v4, %v330_v15  ;;  %v435_v18 = vsel %vm268_vm1, %v415_v14, 0.0  ;;  %v413_v19 = vmul.f32 %v827_v8, %v390_v12 }
 0x19c   :  { %436 = vadd.xlane.f32.xlu1 %v435_v18  ;;  %v705_v20 = vpop.f32.mrf.mxu1 }
 0x19d   :  { %v391_v21 = vmax.f32 %v331_v17, 0.0  ;;  %v352_v22 = vadd.f32 %v705_v20, %v821_v4  ;;  %v429_v23 = vsel %vm268_vm1, %v413_v19, 0.0  ;;  %v416_v24 = vmul.f32 %v827_v8, %v393_v16 }
 0x19e   :  { %v343_v25 = vpop.f32.mrf.mxu1  ;;  %430 = vadd.xlane.f32.xlu0 %v429_v23  ;;  %v511_v23 = vlaneseq }
 0x19f   :  { %v396_v26 = vmax.f32 %v352_v22, 0.0  ;;  %v344_v27 = vadd.f32 %v821_v4, %v343_v25  ;;  %v438_v28 = vsel %vm268_vm1, %v416_v24, 0.0  ;;  %v414_v29 = vmul.f32 %v827_v8, %v391_v21 }
 0x1a0   :  { %439 = vadd.xlane.f32.xlu1 %v438_v28  ;;  %v706_v30 = vpop.f32.mrf.mxu1  ;;  %v876_v24 = vand.u32 127, %v511_v23  ;;  %v879_v28 = vshrl.u32 %v511_v23, 7 }
 0x1a1   :  { %v394_v31 = vmax.f32 %v344_v27, 0.0  ;;  %v355_v32 = vadd.f32 %v706_v30, %v821_v4  ;;  %v432_v33 = vsel %vm268_vm1, %v414_v29, 0.0  ;;  %v419_v34 = vmul.f32 %v827_v8, %v396_v26 }
 0x1a2   :  { %v346_v35 = vpop.f32.mrf.mxu1  ;;  %433 = vadd.xlane.f32.xlu0 %v432_v33  ;;  %v517_v25 = vadd.s32 4294967288, %v876_v24  ;;  %v524_v29 = vadd.s32 4294967280, %v876_v24 }
 0x1a3   :  { %v397_v36 = vmax.f32 %v355_v32, 0.0  ;;  %v347_v37 = vadd.f32 %v821_v4, %v346_v35  ;;  %v447_v39 = vsel %vm268_vm1, %v419_v34, 0.0  ;;  %v417_v43 = vmul.f32 %v827_v8, %v394_v31 }
 0x1a4   :  { %v709_v38 = vpop.f32.mrf.mxu1  ;;  %v520_v30 = vsub.s32 %v517_v25, %v879_v28  ;;  %v515_v31 = vsub.s32 %v876_v24, %v879_v28  ;;  %v531_v34 = vadd.s32 4294967272, %v876_v24 }
 0x1a5   :  { %v395_v40 = vmax.f32 %v347_v37, 0.0  ;;  %v368_v41 = vadd.f32 %v709_v38, %v821_v4  ;;  %v420_v42 = vmul.f32 %v827_v8, %v397_v36  ;;  %v441_v52 = vsel %vm268_vm1, %v417_v43, 0.0 }
 0x1a6   :  { %v359_v44 = vpop.f32.mrf.mxu1  ;;  %448 = vadd.xlane.f32.xlu0 %v447_v39  ;;  %v527_v36 = vsub.s32 %v524_v29, %v879_v28  ;;  %v534_v43 = vsub.s32 %v531_v34, %v879_v28 }
 0x1a7   :  { %v400_v45 = vmax.f32 %v368_v41, 0.0  ;;  %v360_v46 = vadd.f32 %v821_v4, %v359_v44  ;;  %v450_v47 = vsel %vm268_vm1, %v420_v42, 0.0  ;;  %v418_v48 = vmul.f32 %v827_v8, %v395_v40 }
 0x1a8   :  { %451 = vadd.xlane.f32.xlu1 %v450_v47  ;;  %v710_v49 = vpop.f32.mrf.mxu1  ;;  %v538_v40 = vadd.s32 4294967264, %v876_v24  ;;  %v545_v44 = vadd.s32 4294967256, %v876_v24  ;;  %v552_v47 = vadd.s32 4294967248, %v876_v24 }
 0x1a9   :  { %v398_v50 = vmax.f32 %v360_v46, 0.0  ;;  %v371_v51 = vadd.f32 %v710_v49, %v821_v4  ;;  %v423_v53 = vmul.f32 %v827_v8, %v400_v45  ;;  %v444_v57 = vsel %vm268_vm1, %v418_v48, 0.0 }
 0x1aa   :  { %v362_v54 = vpop.f32.mrf.mxu1  ;;  %442 = vadd.xlane.f32.xlu0 %v441_v52 }
 0x1ab   :  { %v401_v55 = vmax.f32 %v371_v51, 0.0  ;;  %v363_v56 = vadd.f32 %v821_v4, %v362_v54  ;;  %v459_v59 = vsel %vm268_vm1, %v423_v53, 0.0  ;;  %v421_v63 = vmul.f32 %v827_v8, %v398_v50 }
 0x1ac   :  { %v713_v58 = vpop.f32.mrf.mxu1  ;;  %445 = vadd.xlane.f32.xlu1 %v444_v57  ;;  %v541_v50 = vsub.s32 %v538_v40, %v879_v28  ;;  %v548_v54 = vsub.s32 %v545_v44, %v879_v28  ;;  %v559_v57 = vadd.s32 4294967240, %v876_v24  ;;  %v615_v40 = vadd.s32 4294967176, %v876_v24 }
 0x1ad   :  { %v399_v60 = vmax.f32 %v363_v56, 0.0  ;;  %v384_v61 = vadd.f32 %v713_v58, %v821_v4  ;;  %v424_v62 = vmul.f32 %v827_v8, %v401_v55  ;;  %v453_v10 = vsel %vm268_vm1, %v421_v63, 0.0 }
 0x1ae   :  { %v375_v0 = vpop.f32.mrf.mxu1  ;;  %460 = vadd.xlane.f32.xlu0 %v459_v59  ;;  %v555_v56 = vsub.s32 %v552_v47, %v879_v28 }
 0x1af   :  { %v376_v1 = vadd.f32 %v821_v4, %v375_v0  ;;  %v462_v2 = vsel %vm268_vm1, %v424_v62, 0.0  ;;  %v422_v3 = vmul.f32 %v827_v8, %v399_v60  ;;  %v404_v6 = vmax.f32 %v384_v61, 0.0 }
 0x1b0   :  { %v714_v5 = vpop.f32.mrf.mxu1  ;;  %463 = vadd.xlane.f32.xlu1 %v462_v2  ;;  %v566_v62 = vadd.s32 4294967232, %v876_v24  ;;  %v580_v0 = vadd.s32 4294967216, %v876_v24 }
 0x1b1   :  { %v402_v7 = vmax.f32 %v376_v1, 0.0  ;;  %v387_v9 = vadd.f32 %v714_v5, %v821_v4  ;;  %v456_v13 = vsel %vm268_vm1, %v422_v3, 0.0  ;;  %v427_v18 = vmul.f32 %v827_v8, %v404_v6 }
 0x1b2   :  { %v378_v11 = vpop.f32.mrf.mxu1  ;;  %454 = vadd.xlane.f32.xlu0 %v453_v10  ;;  %v573_v5 = vadd.s32 4294967224, %v876_v24  ;;  %v562_v6 = vsub.s32 %v559_v57, %v879_v28 }
 0x1b3   :  { %v379_v12 = vadd.f32 %v821_v4, %v378_v11  ;;  %v425_v14 = vmul.f32 %v827_v8, %v402_v7  ;;  %v405_v15 = vmax.f32 %v387_v9, 0.0  ;;  %v471_v21 = vsel %vm268_vm1, %v427_v18, 0.0 }
 0x1b4   :  { %457 = vadd.xlane.f32.xlu1 %v456_v13  ;;  %v587_v9 = vadd.s32 4294967208, %v876_v24  ;;  %v569_v13 = vsub.s32 %v566_v62, %v879_v28 }
 0x1b5   :  { %v403_v16 = vmax.f32 %v379_v12, 0.0  ;;  %v465_v17 = vsel %vm268_vm1, %v425_v14, 0.0  ;;  %v428_v4 = vmul.f32 %v827_v8, %v405_v15  ;;  %v583_v14 = vsub.s32 %v580_v0, %v879_v28 }
 0x1b6   :  { %466 = vadd.xlane.f32.xlu0 %v465_v17 }
 0x1b7   :  { %v426_v19 = vmul.f32 %v827_v8, %v403_v16  ;;  %v474_v22 = vsel %vm268_vm1, %v428_v4, 0.0  ;;  %v885_v8 = vstv %s942_s6  ;;  %v594_v16 = vadd.s32 4294967200, %v876_v24 }
 0x1b8   :  { %v590_v4 = vsub.s32 %v587_v9, %v879_v28 }
 0x1b9   :  { %v468_v20 = vsel %vm268_vm1, %v426_v19, 0.0  ;;  %v576_v19 = vsub.s32 %v573_v5, %v879_v28 }
 0x1ba   :  { %469 = vadd.xlane.f32.xlu1 %v468_v20  ;;  %472 = vadd.xlane.f32.xlu0 %v471_v21 }
 0x1be   :  { %475 = vadd.xlane.f32.xlu1 %v474_v22 }
 0x225   :  { %v437_v26 = vpop.xlane.xlu1 %436 }
 0x226   :  { %v481_v38 = vadd.f32 %v885_v8, %v437_v26 }
 0x227   :  { %v431_v27 = vpop.xlane.xlu0 %430 }
 0x228   :  { %v479_v32 = vadd.f32 %v885_v8, %v431_v27  ;;  %v528_v49 = vrot.slane %v481_v38, %v527_v36  ;;  %v601_v27 = vadd.s32 4294967192, %v876_v24 }
 0x229   :  { %v440_v37 = vpop.xlane.xlu1 %439 }
 0x22a   :  { %v516_v41 = vrot.slane %v479_v32, %v515_v31  ;;  %v482_v45 = vadd.f32 %v885_v8, %v440_v37  ;;  %v608_v32 = vadd.s32 4294967184, %v876_v24 }
 0x22b   :  { %v434_v33 = vpop.xlane.xlu0 %433 }
 0x22c   :  { %v480_v35 = vadd.f32 %v885_v8, %v434_v33  ;;  %v535_v55 = vrot.slane %v482_v45, %v534_v43  ;;  %v611_v44 = vsub.s32 %v608_v32, %v879_v28 }
 0x22e   :  { %v521_v39 = vrot.slane %v480_v35, %v520_v30  ;;  %v597_v30 = vsub.s32 %v594_v16, %v879_v28 }
 0x22f   :  { %v449_v42 = vpop.xlane.xlu0 %448 }
 0x230   :  { %v523_v46 = vsel %vm522_vm2, %v521_v39, %v516_v41  ;;  %v485_v59 = vadd.f32 %v885_v8, %v449_v42  ;;  %v604_v39 = vsub.s32 %v601_v27, %v879_v28 }
 0x231   :  { %v452_v48 = vpop.xlane.xlu1 %451  ;;  %v530_v52 = vsel %vm529_vm3, %v528_v49, %v523_v46 }
 0x232   :  { %v537_v63 = vsel %vm536_vm4, %v535_v55, %v530_v52  ;;  %v486_v7 = vadd.f32 %v885_v8, %v452_v48  ;;  %v556_v11 = vrot.slane %v485_v59, %v555_v56 }
 0x233   :  { %v443_v51 = vpop.xlane.xlu0 %442 }
 0x234   :  { %v483_v53 = vadd.f32 %v885_v8, %v443_v51  ;;  %v563_v20 = vrot.slane %v486_v7, %v562_v6 }
 0x235   :  { %v446_v58 = vpop.xlane.xlu1 %445 }
 0x236   :  { %v542_v60 = vrot.slane %v483_v53, %v541_v50  ;;  %v484_v61 = vadd.f32 %v885_v8, %v446_v58  ;;  %v618_v50 = vsub.s32 %v615_v40, %v879_v28 }
 0x237   :  { %v461_v1 = vpop.xlane.xlu0 %460 }
 0x238   :  { %v544_v2 = vsel %vm543_vm5, %v542_v60, %v537_v63  ;;  %v549_v3 = vrot.slane %v484_v61, %v548_v54  ;;  %v489_v21 = vadd.f32 %v885_v8, %v461_v1 }
 0x239   :  { %v464_v10 = vpop.xlane.xlu1 %463 }
 0x23a   :  { %v551_v12 = vsel %vm550_vm6, %v549_v3, %v544_v2  ;;  %v490_v23 = vadd.f32 %v885_v8, %v464_v10  ;;  %v584_v36 = vrot.slane %v489_v21, %v583_v14 }
 0x23b   :  { %v455_v15 = vpop.xlane.xlu0 %454  ;;  %v558_v17 = vsel %vm557_vm7, %v556_v11, %v551_v12 }
 0x23c   :  { %v487_v18 = vadd.f32 %v885_v8, %v455_v15  ;;  %v565_v29 = vsel %vm564_vm8, %v563_v20, %v558_v17  ;;  %v591_v37 = vrot.slane %v490_v23, %v590_v4 }
 0x23d   :  { %v458_v22 = vpop.xlane.xlu1 %457 }
 0x23e   :  { %v570_v25 = vrot.slane %v487_v18, %v569_v13  ;;  %v488_v26 = vadd.f32 %v885_v8, %v458_v22 }
 0x23f   :  { %v467_v31 = vpop.xlane.xlu0 %466 }
 0x240   :  { %v572_v33 = vsel %vm571_vm9, %v570_v25, %v565_v29  ;;  %v577_v34 = vrot.slane %v488_v26, %v576_v19  ;;  %v491_v35 = vadd.f32 %v885_v8, %v467_v31 }
 0x242   :  { %v579_v38 = vsel %vm578_vm10, %v577_v34, %v572_v33  ;;  %v598_v42 = vrot.slane %v491_v35, %v597_v30 }
 0x243   :  { %v586_v41 = vsel %vm585_vm11, %v584_v36, %v579_v38  ;;  %v470_v43 = vpop.xlane.xlu1 %469  ;;  %v473_v45 = vpop.xlane.xlu0 %472 }
 0x244   :  { %v593_v46 = vsel %vm592_vm12, %v591_v37, %v586_v41  ;;  %v492_v47 = vadd.f32 %v885_v8, %v470_v43  ;;  %v493_v48 = vadd.f32 %v885_v8, %v473_v45 }
 0x245   :  { %v600_v51 = vsel %vm599_vm13, %v598_v42, %v593_v46 }
 0x246   :  { %v605_v49 = vrot.slane %v492_v47, %v604_v39  ;;  %v612_v52 = vrot.slane %v493_v48, %v611_v44 }
 0x247   :  { %v476_v53 = vpop.xlane.xlu1 %475 }
 0x248   :  { %v607_v24 = vsel %vm606_vm14, %v605_v49, %v600_v51  ;;  %v494_v54 = vadd.f32 %v885_v8, %v476_v53 }
 0x249   :  { %v614_v56 = vsel %vm613_vm15, %v612_v52, %v607_v24 }
 0x24a   :  { %v619_v55 = vrot.slane %v494_v54, %v618_v50 }
 0x24c   :  { %v621_v57 = vsel %vm620_vm0, %v619_v55, %v614_v56 }
 0x24d   :  { %623 = vst [vmem:[%s943_s7] sm:$0x1] %v621_v57 }

</bundles_post_ra>
